<compile_context>
chip_gen: v7x
topology: tpu7x:2x2x1
jax: 0.10.0
libtpu: 0.0.40
codegen_flags: <defaults>
</compile_context>

<pallas_src>
import jax
import jax.numpy as jnp
from jax import lax
from jax.experimental import pallas as pl
from jax.experimental.pallas import tpu as pltpu


# ---------------------------------------------------------------------------
# Model dimensions (small synthetic shapes consistent with the forward pass)
# ---------------------------------------------------------------------------
B = 2            # batch
C = 4            # image channels
H = 16           # image height
W = 16           # image width
PATCH = 8        # patch size (conv kernel == stride)
P = (H // PATCH) * (W // PATCH)   # number of patches per image = 4
D_PATCH = C * PATCH * PATCH       # flattened patch dim = 256
HIDDEN = 32      # patch-embed width
EMBED = 32       # output feature dim (last dim that gets L2-normalized)
EPS = 1e-12      # matches F.normalize default eps

# Lane-dense output width.  At real CLIP sizes on v6e/v7x prefer a multiple of 256
# so one vmatmul spans the full 256-wide MXU; on v5e 128 is already optimal.
E_PAD = ((EMBED + 127) // 128) * 128               # 128

# Matmul operand dtype: f32 at toy scale for the strict check; use jnp.bfloat16 on
# v6e/v7x at real CLIP sizes (halves operand DMA, hits the fast MXU rate).
MATMUL_DTYPE = jnp.float32


def _round_up(x, m):
    return (x + m - 1) // m * m


def _pick_b_tile(batch):
    """Batch tile: fill the MXU M dimension, and keep >= 2 parallel grid steps once
    the batch allows it so v7x's two TensorCores both get work."""
    b8 = _round_up(batch, 8)
    tile = min(256, b8)                  # 256 = full MXU height on v6e/v7x
    if b8 // tile < 2 and b8 >= 16:      # split for a >=2-step parallel grid (v7x)
        tile = _round_up(b8 // 2, 8)
    return tile


# ---------------------------------------------------------------------------
# Pallas kernel: fused projection (one MXU matmul) -> exact F.normalize epilogue
# ---------------------------------------------------------------------------
def visual_clip_kernel(pooled_ref, w_fused_ref, b_fused_ref, out_ref):
    # pooled_ref : [B_TILE, D_PATCH]   (mean-pooled patches, MATMUL_DTYPE)
    # w_fused_ref: [D_PATCH, E_PAD]    (zero-padded cols beyond EMBED, MATMUL_DTYPE)
    # b_fused_ref: [1, E_PAD]          (f32, zero-padded)
    # out_ref    : [B_TILE, E_PAD]     (f32, lane-dense unmasked stores)
    feats = jnp.dot(pooled_ref[...], w_fused_ref[...],
                    preferred_element_type=jnp.float32)      # f32 MXU accumulate
    feats = feats + b_fused_ref[...]                          # f32 epilogue (VPU)

    # F.normalize(x, dim=-1) == x / max(||x||, eps) == x * rsqrt(max(sum x^2, eps^2)).
    # Padded columns are exactly zero so the lane-padded sum of squares is exact.
    sumsq = jnp.sum(feats * feats, axis=-1, keepdims=True)
    inv = lax.rsqrt(jnp.maximum(sumsq, EPS * EPS))            # EUP slot, no divide
    out_ref[...] = (feats * inv).astype(out_ref.dtype)


def _patchify_nchw(images):
    """[B, C, H, W] -> [B, P, C*PATCH*PATCH], matching nn.Conv2d weight flattening."""
    b, c, h, w = images.shape
    x = images.reshape(b, c, h // PATCH, PATCH, w // PATCH, PATCH)
    x = jnp.transpose(x, (0, 2, 4, 1, 3, 5))          # [B, Hp, Wp, C, ph, pw]
    return x.reshape(b, (h // PATCH) * (w // PATCH), c * PATCH * PATCH)


def visual_clip_forward(images, params, normalize=True, matmul_dtype=MATMUL_DTYPE):
    """Equivalent of VisualClipBase.forward(images, normalize=True)."""
    w_embed, b_embed, w_proj, b_proj = params
    batch = images.shape[0]
    patches = _patchify_nchw(images).astype(jnp.float32)    # [B, P, D_PATCH]

    # Pool BEFORE the kernel: mean over patches commutes with the two linear layers
    # (exact), so the kernel never sees the [B, P, D_PATCH] block.
    pooled = jnp.mean(patches, axis=1)                      # [B, D_PATCH]

    # Fold both linear layers into one fused projection (exact: pre-norm path is linear).
    w_fused = w_embed @ w_proj                              # [D_PATCH, EMBED]
    b_fused = b_embed @ w_proj + b_proj                     # [1, EMBED]

    if not normalize:
        # TODO(synk): non-normalized branch computed in plain JAX (kernel always normalizes).
        return pooled @ w_fused + b_fused

    b_tile = _pick_b_tile(batch)
    b_pad = _round_up(batch, b_tile)

    # Only small, one-time pads remain (weights + the pooled [B, D_PATCH] rows);
    # the big patches array is never padded/materialized.
    pooled_p = jnp.pad(pooled, ((0, b_pad - batch), (0, 0))).astype(matmul_dtype)
    w_fused_p = jnp.pad(w_fused, ((0, 0), (0, E_PAD - EMBED))).astype(matmul_dtype)
    b_fused_p = jnp.pad(b_fused, ((0, 0), (0, E_PAD - EMBED))).astype(jnp.float32)

    grid = (b_pad // b_tile,)

    def run(single_buffer_weights):
        const_kwargs = (
            dict(pipeline_mode=pl.Buffered(1)) if single_buffer_weights else {}
        )
        return pl.pallas_call(
            visual_clip_kernel,
            out_shape=jax.ShapeDtypeStruct((b_pad, E_PAD), jnp.float32),
            grid=grid,
            in_specs=[
                pl.BlockSpec((b_tile, D_PATCH), lambda i: (i, 0)),
                # Constant-index weight/bias: single-buffered (DMA issued once).
                pl.BlockSpec((D_PATCH, E_PAD), lambda i: (0, 0), **const_kwargs),
                pl.BlockSpec((1, E_PAD), lambda i: (0, 0), **const_kwargs),
            ],
            out_specs=pl.BlockSpec((b_tile, E_PAD), lambda i: (i, 0)),
            compiler_params=pltpu.CompilerParams(
                dimension_semantics=("parallel",),
                # Raise toward 64-100 MiB on v5e/v6e when scaling b_tile / E tile;
                # keep headroom under v7x's 64 MiB physical VMEM.
                vmem_limit_bytes=32 * 1024 * 1024,
            ),
        )(pooled_p, w_fused_p, b_fused_p)

    try:
        out = run(True)
    except Exception:
        # Fallback for jax builds without pipeline_mode / Buffered(1) support.
        out = run(False)

    return out[:batch, :EMBED]


def init_params(key):
    k1, k2, k3, k4 = jax.random.split(key, 4)
    w_embed = jax.random.normal(k1, (D_PATCH, HIDDEN), jnp.float32) * 0.02
    b_embed = jax.random.normal(k2, (1, HIDDEN), jnp.float32) * 0.01
    w_proj = jax.random.normal(k3, (HIDDEN, EMBED), jnp.float32) * 0.02
    b_proj = jax.random.normal(k4, (1, EMBED), jnp.float32) * 0.01
    return w_embed, b_embed, w_proj, b_proj


def reference_forward(images, params):
    """Pure-JAX reference mirroring the PyTorch semantics (unfused path)."""
    w_embed, b_embed, w_proj, b_proj = params
    patches = _patchify_nchw(images).astype(jnp.float32)
    h = jnp.einsum("bpd,dk->bpk", patches, w_embed) + b_embed[None, :, :]
    feats = jnp.mean(h, axis=1) @ w_proj + b_proj
    norm = jnp.sqrt(jnp.sum(feats * feats, axis=-1, keepdims=True))
    return feats / jnp.maximum(norm, EPS)      # F.normalize: x / max(||x||, eps)


if __name__ == "__main__":
    key = jax.random.PRNGKey(0)
    k_img, k_par = jax.random.split(key)
    images = jax.random.normal(k_img, (B, C, H, W), jnp.float32)  # NCHW input
    params = init_params(k_par)

    out = visual_clip_forward(images, params, normalize=True)
    out = jax.block_until_ready(out)

    ref = reference_forward(images, params)
    assert out.shape == (B, EMBED)
    assert jnp.allclose(out, ref, atol=1e-5, rtol=1e-5), "mismatch vs reference"
    # L2 norm of each row should be ~1
    assert jnp.allclose(jnp.linalg.norm(out, axis=-1), 1.0, atol=1e-5)

    print("KERNEL_OK")
</pallas_src>

<mosaic_0001>
module attributes {stable_mosaic.version = 11 : i64} {
  func.func @visual_clip_kernel(%arg0: i32, %arg1: memref<8x256xf32, #tpu.memory_space<vmem>>, %arg2: memref<256x128xf32, #tpu.memory_space<vmem>>, %arg3: memref<1x128xf32, #tpu.memory_space<vmem>>, %arg4: memref<8x128xf32, #tpu.memory_space<vmem>>) attributes {dimension_semantics = [#tpu.dimension_semantics<parallel>], iteration_bounds = array<i64: 1>, scalar_prefetch = 0 : i64, scratch_operands = 0 : i64, tpu.core_type = #tpu.core_type<tc>, window_params = [{transform_indices = @transform_0, window_bounds = array<i64: 8, 256>}, {pipeline_mode = #tpu.pipeline_mode<synchronous>, transform_indices = @transform_1, window_bounds = array<i64: 256, 128>}, {pipeline_mode = #tpu.pipeline_mode<synchronous>, transform_indices = @transform_2, window_bounds = array<i64: 1, 128>}, {transform_indices = @transform_3, window_bounds = array<i64: 8, 128>}]} {
    %c0 = arith.constant 0 : index
    %c0_0 = arith.constant 0 : index
    %0 = vector.load %arg1[%c0, %c0_0] : memref<8x256xf32, #tpu.memory_space<vmem>>, vector<8x256xf32>
    %c0_1 = arith.constant 0 : index
    %c0_2 = arith.constant 0 : index
    %1 = vector.load %arg2[%c0_1, %c0_2] : memref<256x128xf32, #tpu.memory_space<vmem>>, vector<256x128xf32>
    %cst = arith.constant dense<0.000000e+00> : vector<8x128xf32>
    %2 = tpu.matmul %0, %1, %cst {dimension_numbers = #tpu.dot_dimension_numbers<[1], [0], [0], [1], [0, 0, 1, 1], [], []>} : vector<8x256xf32>, vector<256x128xf32>, vector<8x128xf32> -> vector<8x128xf32>
    %c0_3 = arith.constant 0 : index
    %c0_4 = arith.constant 0 : index
    %3 = vector.load %arg3[%c0_3, %c0_4] : memref<1x128xf32, #tpu.memory_space<vmem>>, vector<1x128xf32>
    %4 = vector.broadcast %3 : vector<1x128xf32> to vector<8x128xf32>
    %5 = arith.addf %2, %4 : vector<8x128xf32>
    %6 = arith.mulf %5, %5 : vector<8x128xf32>
    %cst_5 = arith.constant dense<0.000000e+00> : vector<8xf32>
    %7 = vector.multi_reduction <add>, %6, %cst_5 [1] : vector<8x128xf32> to vector<8xf32>
    %8 = vector.shape_cast %7 : vector<8xf32> to vector<8x1xf32>
    %cst_6 = arith.constant 1.000000e-24 : f32
    %9 = vector.broadcast %cst_6 : f32 to vector<8x1xf32>
    %10 = arith.maximumf %8, %9 : vector<8x1xf32>
    %11 = math.rsqrt %10 : vector<8x1xf32>
    %12 = vector.broadcast %11 : vector<8x1xf32> to vector<8x128xf32>
    %13 = arith.mulf %5, %12 : vector<8x128xf32>
    %c0_7 = arith.constant 0 : index
    %c0_8 = arith.constant 0 : index
    %14 = vector.load %arg4[%c0_7, %c0_8] : memref<8x128xf32, #tpu.memory_space<vmem>>, vector<8x128xf32>
    tpu.vector_store %arg4[%c0_7, %c0_8], %13 {strides = array<i32>} : memref<8x128xf32, #tpu.memory_space<vmem>>, vector<8x128xf32>,
    return
  }
  func.func @transform_0(%arg0: i32) -> (i32, i32) {
    %c0_i32 = arith.constant 0 : i32
    %c0_i32_0 = arith.constant 0 : i32
    return %arg0, %c0_i32 : i32, i32
  }
  func.func @transform_1(%arg0: i32) -> (i32, i32) {
    %c0_i32 = arith.constant 0 : i32
    %c0_i32_0 = arith.constant 0 : i32
    %c0_i32_1 = arith.constant 0 : i32
    return %c0_i32, %c0_i32_0 : i32, i32
  }
  func.func @transform_2(%arg0: i32) -> (i32, i32) {
    %c0_i32 = arith.constant 0 : i32
    %c0_i32_0 = arith.constant 0 : i32
    %c0_i32_1 = arith.constant 0 : i32
    return %c0_i32, %c0_i32_0 : i32, i32
  }
  func.func @transform_3(%arg0: i32) -> (i32, i32) {
    %c0_i32 = arith.constant 0 : i32
    %c0_i32_0 = arith.constant 0 : i32
    return %arg0, %c0_i32 : i32, i32
  }
}

module attributes {stable_mosaic.version = 11 : i64} {
  func.func @visual_clip_kernel(%arg0: i32, %arg1: memref<8x256xf32, #tpu.memory_space<vmem>>, %arg2: memref<256x128xf32, #tpu.memory_space<vmem>>, %arg3: memref<1x128xf32, #tpu.memory_space<vmem>>, %arg4: memref<8x128xf32, #tpu.memory_space<vmem>>) attributes {dimension_semantics = [#tpu.dimension_semantics<parallel>], iteration_bounds = array<i64: 1>, scalar_prefetch = 0 : i64, scratch_operands = 0 : i64, tpu.core_type = #tpu.core_type<tc>, window_params = [{transform_indices = @transform_0, window_bounds = array<i64: 8, 256>}, {pipeline_mode = #tpu.pipeline_mode<synchronous>, transform_indices = @transform_1, window_bounds = array<i64: 256, 128>}, {pipeline_mode = #tpu.pipeline_mode<synchronous>, transform_indices = @transform_2, window_bounds = array<i64: 1, 128>}, {transform_indices = @transform_3, window_bounds = array<i64: 8, 128>}]} {
    %c0 = arith.constant 0 : index
    %c0_0 = arith.constant 0 : index
    %0 = vector.load %arg1[%c0, %c0_0] : memref<8x256xf32, #tpu.memory_space<vmem>>, vector<8x256xf32>
    %c0_1 = arith.constant 0 : index
    %c0_2 = arith.constant 0 : index
    %1 = vector.load %arg2[%c0_1, %c0_2] : memref<256x128xf32, #tpu.memory_space<vmem>>, vector<256x128xf32>
    %cst = arith.constant dense<0.000000e+00> : vector<8x128xf32>
    %2 = tpu.matmul %0, %1, %cst {dimension_numbers = #tpu.dot_dimension_numbers<[1], [0], [0], [1], [0, 0, 1, 1], [], []>} : vector<8x256xf32>, vector<256x128xf32>, vector<8x128xf32> -> vector<8x128xf32>
    %c0_3 = arith.constant 0 : index
    %c0_4 = arith.constant 0 : index
    %3 = vector.load %arg3[%c0_3, %c0_4] : memref<1x128xf32, #tpu.memory_space<vmem>>, vector<1x128xf32>
    %4 = vector.broadcast %3 : vector<1x128xf32> to vector<8x128xf32>
    %5 = arith.addf %2, %4 : vector<8x128xf32>
    %6 = arith.mulf %5, %5 : vector<8x128xf32>
    %cst_5 = arith.constant dense<0.000000e+00> : vector<8xf32>
    %7 = vector.multi_reduction <add>, %6, %cst_5 [1] : vector<8x128xf32> to vector<8xf32>
    %8 = vector.shape_cast %7 : vector<8xf32> to vector<8x1xf32>
    %cst_6 = arith.constant 1.000000e-24 : f32
    %9 = vector.broadcast %cst_6 : f32 to vector<8x1xf32>
    %10 = arith.maximumf %8, %9 : vector<8x1xf32>
    %11 = math.rsqrt %10 : vector<8x1xf32>
    %12 = vector.broadcast %11 : vector<8x1xf32> to vector<8x128xf32>
    %13 = arith.mulf %5, %12 : vector<8x128xf32>
    %c0_7 = arith.constant 0 : index
    %c0_8 = arith.constant 0 : index
    %14 = vector.load %arg4[%c0_7, %c0_8] : memref<8x128xf32, #tpu.memory_space<vmem>>, vector<8x128xf32>
    tpu.vector_store %arg4[%c0_7, %c0_8], %13 {strides = array<i32>} : memref<8x128xf32, #tpu.memory_space<vmem>>, vector<8x128xf32>,
    return
  }
  func.func @transform_0(%arg0: i32) -> (i32, i32) {
    %c0_i32 = arith.constant 0 : i32
    %c0_i32_0 = arith.constant 0 : i32
    return %arg0, %c0_i32 : i32, i32
  }
  func.func @transform_1(%arg0: i32) -> (i32, i32) {
    %c0_i32 = arith.constant 0 : i32
    %c0_i32_0 = arith.constant 0 : i32
    %c0_i32_1 = arith.constant 0 : i32
    return %c0_i32, %c0_i32_0 : i32, i32
  }
  func.func @transform_2(%arg0: i32) -> (i32, i32) {
    %c0_i32 = arith.constant 0 : i32
    %c0_i32_0 = arith.constant 0 : i32
    %c0_i32_1 = arith.constant 0 : i32
    return %c0_i32, %c0_i32_0 : i32, i32
  }
  func.func @transform_3(%arg0: i32) -> (i32, i32) {
    %c0_i32 = arith.constant 0 : i32
    %c0_i32_0 = arith.constant 0 : i32
    return %arg0, %c0_i32 : i32, i32
  }
}

</mosaic_0001>

<bundles_post_ra>
// kernel: tpu_custom_call.1
= control target key start
LH: loop header
LB: loop body
LE: loop exit
PB: predicated region body
PF: predicated region fallthrough
CT: control target
= control target key end

     0   :  { %8 = vsyncpa [#allocation3], 0  ;;  %s393_s0 = inlined_call_operand.hbm [shape: f32[8,256], index: 0, kind: input, shape index: {}]   ;;  %s394_s1 = inlined_call_operand.hbm [shape: f32[256,128], index: 1, kind: input, shape index: {}]   ;;  %s395_s2 = inlined_call_operand.vmem [shape: f32[1,128], index: 2, kind: input, shape index: {}]   ;;  %s396_s3 = inlined_call_operand.hbm [shape: f32[8,128], index: 3, kind: output, shape index: {}]  }
   0x1   :  { %9 = vsyncpa [#allocation6], 0 }
   0x2   :  { %10 = vsyncpa [#allocation4], 0  ;;  %s322_s12 = smov [#allocation2]   ;;  %s323_s14 = smov [#allocation5]  }
   0x3   :  { %s17_s13 = sshll.u32 %s322_s12, 4  ;;  %s26_s15 = sshll.u32 %s323_s14, 4  ;;  %s18_s13 = int_to_ptr.vmem [resolvable:$true] %s17_s13  ;;  %s347_s15 = int_to_ptr.vmem [resolvable:$true] %s26_s15 }
   0x4   :  { %s250_s18 = scalar_lea.hbm %s393_s0, 256 }
   0x5   :  { %p251_p0 = scmp.ne.s32.totalorder %s393_s0, %s250_s18  ;;  %p254_p1 = scmp.lt.u32.totalorder %s250_s18, %s393_s0 }
   0x7   :  { %p256_p2 = pnand %p254_p1, %p251_p0 }
   0x9   :  { %259 = shalt.err (!%p256_p2)
}
   0xa   :  { %s260_s23 = scalar_lea.vmem %s18_s13, 256  ;;  %p265_p4 = scmp.lt.s32.totalorder %s18_s13, %s18_s13 }
   0xb   :  { %p261_p3 = scmp.ne.s32.totalorder %s18_s13, %s260_s23  ;;  %p266_p5 = scmp.lt.s32.totalorder %s260_s23, %s260_s23 }
   0xd   :  { %p267_p6 = por %p266_p5, %p265_p4 }
   0xf   :  { %p268_p7 = pnand %p267_p6, %p261_p3 }
  0x11   :  { %271 = shalt.err (!%p268_p7)
}
  0x12   :  { %20 = dma.hbm_to_vmem [thread:$0]  %s393_s0, 256, %s18_s13, [#allocation3]  }
  0x13   :  { %s272_s28 = scalar_lea.hbm %s394_s1, 4096 }
  0x14   :  { %p273_p8 = scmp.ne.s32.totalorder %s394_s1, %s272_s28  ;;  %p276_p9 = scmp.lt.u32.totalorder %s272_s28, %s394_s1 }
  0x16   :  { %p278_p10 = pnand %p276_p9, %p273_p8 }
  0x18   :  { %281 = shalt.err (!%p278_p10)
}
  0x19   :  { %s282_s6 = scalar_lea.vmem %s347_s15, 4096  ;;  %p287_p12 = scmp.lt.s32.totalorder %s347_s15, %s347_s15 }
  0x1a   :  { %p283_p11 = scmp.ne.s32.totalorder %s347_s15, %s282_s6  ;;  %p288_p13 = scmp.lt.s32.totalorder %s282_s6, %s282_s6 }
  0x1c   :  { %p289_p0 = por %p288_p13, %p287_p12 }
  0x1e   :  { %p290_p1 = pnand %p289_p0, %p283_p11 }
  0x20   :  { %293 = shalt.err (!%p290_p1)
}
  0x21   :  { %s324_s0 = smov 128   ;;  %s325_s7 = smov 8  }
  0x22   :  { %32 = dma.hbm_to_vmem [thread:$0]  %s394_s1, 4096, %s347_s15, [#allocation6], %s324_s0, %s324_s0, %s325_s7  }
  0x23   :  { %316 = dma.done.wait [#allocation3], 256  }
  0x24   :  { %317 = vsyncadd [#allocation3], 4294967040 }
  0x25   :  { %318 = dma.done.wait [#allocation6], 4096  }
  0x26   :  { %319 = vsyncadd [#allocation6], 4294963200  ;;  %v59_v0 = vld [vmem:[#allocation5 + $0x80] sm:$0xff]  ;;  %v60_v1 = vld [vmem:[#allocation5 + $0x88] sm:$0xff]  ;;  %s326_s11 = smov [#allocation7]  }
  0x27   :  { %v43_v2 = vld [vmem:[#allocation5] sm:$0xff]  ;;  %v211_v3 = vpack.c.bf16 %v60_v1, %v59_v0  ;;  %v44_v4 = vld [vmem:[#allocation5 + $0x8] sm:$0xff]  ;;  %v61_v5 = vld [vmem:[#allocation5 + $0x90] sm:$0xff]  ;;  %s165_s12 = sshll.u32 %s326_s11, 4  ;;  %s166_s12 = int_to_ptr.vmem [resolvable:$true] %s165_s12 }
  0x28   :  { %v62_v6 = vld [vmem:[#allocation5 + $0x98] sm:$0xff]  ;;  %v213_v7 = vpack.c.bf16 %v44_v4, %v43_v2  ;;  %v45_v9 = vld [vmem:[#allocation5 + $0x10] sm:$0xff]  ;;  %v63_v11 = vld [vmem:[#allocation5 + $0xa0] sm:$0xff]  ;;  %s294_s13 = scalar_lea.vmem %s166_s12, 128  ;;  %p299_p3 = scmp.lt.s32.totalorder %s166_s12, %s166_s12 }
  0x29   :  { %v215_v8 = vpack.c.bf16 %v62_v6, %v61_v5  ;;  %v46_v10 = vld [vmem:[#allocation5 + $0x18] sm:$0xff]  ;;  %212 = vmatprep.subr.bf16.mxu0 %v211_v3  ;;  %v64_v12 = vld [vmem:[#allocation5 + $0xa8] sm:$0xff]  ;;  %v47_v15 = vld [vmem:[#allocation5 + $0x20] sm:$0xff]  ;;  %p295_p2 = scmp.ne.s32.totalorder %s166_s12, %s294_s13  ;;  %p300_p4 = scmp.lt.s32.totalorder %s294_s13, %s294_s13 }
  0x2a   :  { %214 = vmatpush3.bf16.msra.mxu0 %v213_v7  ;;  %v217_v13 = vpack.c.bf16 %v46_v10, %v45_v9  ;;  %v219_v14 = vpack.c.bf16 %v64_v12, %v63_v11  ;;  %v48_v16 = vld [vmem:[#allocation5 + $0x28] sm:$0xff]  ;;  %v65_v17 = vld [vmem:[#allocation5 + $0xb0] sm:$0xff]  ;;  %v66_v18 = vld [vmem:[#allocation5 + $0xb8] sm:$0xff] }
  0x2b   :  { %216 = vmatprep.subr.bf16.mxu0 %v215_v8  ;;  %v221_v19 = vpack.c.bf16 %v48_v16, %v47_v15  ;;  %v223_v20 = vpack.c.bf16 %v66_v18, %v65_v17  ;;  %v49_v21 = vld [vmem:[#allocation5 + $0x30] sm:$0xff]  ;;  %v50_v22 = vld [vmem:[#allocation5 + $0x38] sm:$0xff]  ;;  %v67_v23 = vld [vmem:[#allocation5 + $0xc0] sm:$0xff]  ;;  %p301_p5 = por %p300_p4, %p299_p3 }
  0x2c   :  { %v68_v24 = vld [vmem:[#allocation5 + $0xc8] sm:$0xff]  ;;  %v42_v25 = vld [vmem:[#allocation2 + $0x8] sm:$0xff]  ;;  %v225_v26 = vpack.c.bf16 %v50_v22, %v49_v21  ;;  %v51_v28 = vld [vmem:[#allocation5 + $0x40] sm:$0xff] }
  0x2d   :  { %146 = vmatprep.mubr.f32.mxu0 %v42_v25  ;;  %v227_v27 = vpack.c.bf16 %v68_v24, %v67_v23  ;;  %v52_v29 = vld [vmem:[#allocation5 + $0x48] sm:$0xff]  ;;  %v69_v30 = vld [vmem:[#allocation5 + $0xd0] sm:$0xff]  ;;  %v70_v31 = vld [vmem:[#allocation5 + $0xd8] sm:$0xff]  ;;  %p302_p6 = pnand %p301_p5, %p295_p2 }
  0x2e   :  { %218 = vmatpush3.bf16.msra.mxu0 %v217_v13  ;;  %v229_v32 = vpack.c.bf16 %v52_v29, %v51_v28  ;;  %v231_v33 = vpack.c.bf16 %v70_v31, %v69_v30  ;;  %v53_v34 = vld [vmem:[#allocation5 + $0x50] sm:$0xff]  ;;  %v54_v35 = vld [vmem:[#allocation5 + $0x58] sm:$0xff]  ;;  %v71_v36 = vld [vmem:[#allocation5 + $0xe0] sm:$0xff] }
  0x2f   :  { %220 = vmatprep.subr.bf16.mxu0 %v219_v14  ;;  %v72_v37 = vld [vmem:[#allocation5 + $0xe8] sm:$0xff]  ;;  %v233_v38 = vpack.c.bf16 %v54_v35, %v53_v34  ;;  %v55_v40 = vld [vmem:[#allocation5 + $0x60] sm:$0xff]  ;;  %v73_v42 = vld [vmem:[#allocation5 + $0xf0] sm:$0xff] }
  0x30   :  { %v235_v39 = vpack.c.bf16 %v72_v37, %v71_v36  ;;  %v56_v41 = vld [vmem:[#allocation5 + $0x68] sm:$0xff]  ;;  %v74_v43 = vld [vmem:[#allocation5 + $0xf8] sm:$0xff]  ;;  %v57_v46 = vld [vmem:[#allocation5 + $0x70] sm:$0xff] }
  0x31   :  { %v237_v44 = vpack.c.bf16 %v56_v41, %v55_v40  ;;  %v239_v45 = vpack.c.bf16 %v74_v43, %v73_v42  ;;  %v58_v47 = vld [vmem:[#allocation5 + $0x78] sm:$0xff]  ;;  %v41_v49 = vld [vmem:[#allocation2] sm:$0xff] }
  0x32   :  { %222 = vmatpush3.bf16.msra.mxu0 %v221_v19  ;;  %v241_v48 = vpack.c.bf16 %v58_v47, %v57_v46  ;;  %v175_v52 = vld [vmem:[%s395_s2] ss:$0 sm:$0xff] }
  0x33   :  { %224 = vmatprep.subr.bf16.mxu0 %v223_v20 }
  0x36   :  { %226 = vmatpush3.bf16.msra.mxu0 %v225_v26 }
  0x37   :  { %228 = vmatprep.subr.bf16.mxu0 %v227_v27 }
  0x3a   :  { %230 = vmatpush3.bf16.msra.mxu0 %v229_v32 }
  0x3b   :  { %232 = vmatprep.subr.bf16.mxu0 %v231_v33 }
  0x3e   :  { %234 = vmatpush3.bf16.msra.mxu0 %v233_v38 }
  0x3f   :  { %236 = vmatprep.subr.bf16.mxu0 %v235_v39 }
  0x42   :  { %238 = vmatpush3.bf16.msra.mxu0 %v237_v44 }
  0x43   :  { %240 = vmatprep.subr.bf16.mxu0 %v239_v45 }
  0x46   :  { %242 = vmatpush3.bf16.msra.mxu0 %v241_v48 }
  0x49   :  { %147 = vmatmul.mubr.f32.vlgmr.msra.gmra.mrb[0].mxu0 %v41_v49 }
 0x11c   :  { %v208_v50 = vpop.f32.mrb[0].mxu0 }
 0x11d   :  { %v209_v51 = vpop.f32.mrb[1].mxu0 }
 0x11e   :  { %v210_v53 = vadd.f32 %v209_v51, %v208_v50 }
 0x120   :  { %v149_v54 = vadd.f32 %v210_v53, %v175_v52 }
 0x122   :  { %v152_v55 = vmul.f32 %v149_v54, %v149_v54 }
 0x124   :  { %153 = vadd.xlane.f32.xlu0 %v152_v55 }
 0x1b1   :  { %v154_v56 = vpop.xlane.xlu0 %153 }
 0x1b2   :  { %v155_v57 = vmax.f32 %v154_v56, 1e-24 }
 0x1b4   :  { %248 = vrsqrt.f32 %v155_v57 }
 0x1be   :  { %v249_v58 = vpop.eup %248 }
 0x1bf   :  { %v157_v59 = vmul.f32 %v249_v58, %v149_v54 }
 0x1c1   :  { %158 = vst [vmem:[#allocation7] sm:$0xff] %v157_v59 }
 0x1c2   :  { %305 = shalt.err (!%p302_p6)
}
 0x1c3   :  { %s306_s15 = scalar_lea.hbm %s396_s3, 128 }
 0x1c4   :  { %p307_p7 = scmp.ne.s32.totalorder %s396_s3, %s306_s15  ;;  %p310_p8 = scmp.lt.u32.totalorder %s306_s15, %s396_s3 }
 0x1c6   :  { %p312_p9 = pnand %p310_p8, %p307_p7 }
 0x1c8   :  { %315 = shalt.err (!%p312_p9)
}
 0x1c9   :  { %168 = dma.vmem_to_hbm [thread:$0]  %s166_s12, 128, %s396_s3, [#allocation4]  }
 0x1ca   :  { %320 = dma.done.wait [#allocation4], 128  }
 0x1cb   :  { %321 = vsyncadd [#allocation4], 4294967168 }
 0x1cc   :  { %172 = vsyncpa [#allocation3], 1 }
 0x1cd   :  { %173 = vsyncpa [#allocation6], 1 }
 0x1ce   :  { %174 = vsyncpa [#allocation4], 1 }

// kernel: tpu_custom_call.1
= control target key start
LH: loop header
LB: loop body
LE: loop exit
PB: predicated region body
PF: predicated region fallthrough
CT: control target
= control target key end

     0   :  { %8 = vsyncpa [#allocation3], 0  ;;  %s393_s0 = inlined_call_operand.hbm [shape: f32[8,256], index: 0, kind: input, shape index: {}]   ;;  %s394_s1 = inlined_call_operand.hbm [shape: f32[256,128], index: 1, kind: input, shape index: {}]   ;;  %s395_s2 = inlined_call_operand.vmem [shape: f32[1,128], index: 2, kind: input, shape index: {}]   ;;  %s396_s3 = inlined_call_operand.hbm [shape: f32[8,128], index: 3, kind: output, shape index: {}]  }
   0x1   :  { %9 = vsyncpa [#allocation6], 0 }
   0x2   :  { %10 = vsyncpa [#allocation4], 0  ;;  %s322_s12 = smov [#allocation2]   ;;  %s323_s14 = smov [#allocation5]  }
   0x3   :  { %s17_s13 = sshll.u32 %s322_s12, 4  ;;  %s26_s15 = sshll.u32 %s323_s14, 4  ;;  %s18_s13 = int_to_ptr.vmem [resolvable:$true] %s17_s13  ;;  %s347_s15 = int_to_ptr.vmem [resolvable:$true] %s26_s15 }
   0x4   :  { %s250_s18 = scalar_lea.hbm %s393_s0, 256 }
   0x5   :  { %p251_p0 = scmp.ne.s32.totalorder %s393_s0, %s250_s18  ;;  %p254_p1 = scmp.lt.u32.totalorder %s250_s18, %s393_s0 }
   0x7   :  { %p256_p2 = pnand %p254_p1, %p251_p0 }
   0x9   :  { %259 = shalt.err (!%p256_p2)
}
   0xa   :  { %s260_s23 = scalar_lea.vmem %s18_s13, 256  ;;  %p265_p4 = scmp.lt.s32.totalorder %s18_s13, %s18_s13 }
   0xb   :  { %p261_p3 = scmp.ne.s32.totalorder %s18_s13, %s260_s23  ;;  %p266_p5 = scmp.lt.s32.totalorder %s260_s23, %s260_s23 }
   0xd   :  { %p267_p6 = por %p266_p5, %p265_p4 }
   0xf   :  { %p268_p7 = pnand %p267_p6, %p261_p3 }
  0x11   :  { %271 = shalt.err (!%p268_p7)
}
  0x12   :  { %20 = dma.hbm_to_vmem [thread:$0]  %s393_s0, 256, %s18_s13, [#allocation3]  }
  0x13   :  { %s272_s28 = scalar_lea.hbm %s394_s1, 4096 }
  0x14   :  { %p273_p8 = scmp.ne.s32.totalorder %s394_s1, %s272_s28  ;;  %p276_p9 = scmp.lt.u32.totalorder %s272_s28, %s394_s1 }
  0x16   :  { %p278_p10 = pnand %p276_p9, %p273_p8 }
  0x18   :  { %281 = shalt.err (!%p278_p10)
}
  0x19   :  { %s282_s6 = scalar_lea.vmem %s347_s15, 4096  ;;  %p287_p12 = scmp.lt.s32.totalorder %s347_s15, %s347_s15 }
  0x1a   :  { %p283_p11 = scmp.ne.s32.totalorder %s347_s15, %s282_s6  ;;  %p288_p13 = scmp.lt.s32.totalorder %s282_s6, %s282_s6 }
  0x1c   :  { %p289_p0 = por %p288_p13, %p287_p12 }
  0x1e   :  { %p290_p1 = pnand %p289_p0, %p283_p11 }
  0x20   :  { %293 = shalt.err (!%p290_p1)
}
  0x21   :  { %s324_s0 = smov 128   ;;  %s325_s7 = smov 8  }
  0x22   :  { %32 = dma.hbm_to_vmem [thread:$0]  %s394_s1, 4096, %s347_s15, [#allocation6], %s324_s0, %s324_s0, %s325_s7  }
  0x23   :  { %316 = dma.done.wait [#allocation3], 256  }
  0x24   :  { %317 = vsyncadd [#allocation3], 4294967040 }
  0x25   :  { %318 = dma.done.wait [#allocation6], 4096  }
  0x26   :  { %319 = vsyncadd [#allocation6], 4294963200  ;;  %v59_v0 = vld [vmem:[#allocation5 + $0x80] sm:$0xff]  ;;  %v60_v1 = vld [vmem:[#allocation5 + $0x88] sm:$0xff]  ;;  %s326_s11 = smov [#allocation7]  }
  0x27   :  { %v43_v2 = vld [vmem:[#allocation5] sm:$0xff]  ;;  %v211_v3 = vpack.c.bf16 %v60_v1, %v59_v0  ;;  %v44_v4 = vld [vmem:[#allocation5 + $0x8] sm:$0xff]  ;;  %v61_v5 = vld [vmem:[#allocation5 + $0x90] sm:$0xff]  ;;  %s165_s12 = sshll.u32 %s326_s11, 4  ;;  %s166_s12 = int_to_ptr.vmem [resolvable:$true] %s165_s12 }
  0x28   :  { %v62_v6 = vld [vmem:[#allocation5 + $0x98] sm:$0xff]  ;;  %v213_v7 = vpack.c.bf16 %v44_v4, %v43_v2  ;;  %v45_v9 = vld [vmem:[#allocation5 + $0x10] sm:$0xff]  ;;  %v63_v11 = vld [vmem:[#allocation5 + $0xa0] sm:$0xff]  ;;  %s294_s13 = scalar_lea.vmem %s166_s12, 128  ;;  %p299_p3 = scmp.lt.s32.totalorder %s166_s12, %s166_s12 }
  0x29   :  { %v215_v8 = vpack.c.bf16 %v62_v6, %v61_v5  ;;  %v46_v10 = vld [vmem:[#allocation5 + $0x18] sm:$0xff]  ;;  %212 = vmatprep.subr.bf16.mxu0 %v211_v3  ;;  %v64_v12 = vld [vmem:[#allocation5 + $0xa8] sm:$0xff]  ;;  %v47_v15 = vld [vmem:[#allocation5 + $0x20] sm:$0xff]  ;;  %p295_p2 = scmp.ne.s32.totalorder %s166_s12, %s294_s13  ;;  %p300_p4 = scmp.lt.s32.totalorder %s294_s13, %s294_s13 }
  0x2a   :  { %214 = vmatpush3.bf16.msra.mxu0 %v213_v7  ;;  %v217_v13 = vpack.c.bf16 %v46_v10, %v45_v9  ;;  %v219_v14 = vpack.c.bf16 %v64_v12, %v63_v11  ;;  %v48_v16 = vld [vmem:[#allocation5 + $0x28] sm:$0xff]  ;;  %v65_v17 = vld [vmem:[#allocation5 + $0xb0] sm:$0xff]  ;;  %v66_v18 = vld [vmem:[#allocation5 + $0xb8] sm:$0xff] }
  0x2b   :  { %216 = vmatprep.subr.bf16.mxu0 %v215_v8  ;;  %v221_v19 = vpack.c.bf16 %v48_v16, %v47_v15  ;;  %v223_v20 = vpack.c.bf16 %v66_v18, %v65_v17  ;;  %v49_v21 = vld [vmem:[#allocation5 + $0x30] sm:$0xff]  ;;  %v50_v22 = vld [vmem:[#allocation5 + $0x38] sm:$0xff]  ;;  %v67_v23 = vld [vmem:[#allocation5 + $0xc0] sm:$0xff]  ;;  %p301_p5 = por %p300_p4, %p299_p3 }
  0x2c   :  { %v68_v24 = vld [vmem:[#allocation5 + $0xc8] sm:$0xff]  ;;  %v42_v25 = vld [vmem:[#allocation2 + $0x8] sm:$0xff]  ;;  %v225_v26 = vpack.c.bf16 %v50_v22, %v49_v21  ;;  %v51_v28 = vld [vmem:[#allocation5 + $0x40] sm:$0xff] }
  0x2d   :  { %146 = vmatprep.mubr.f32.mxu0 %v42_v25  ;;  %v227_v27 = vpack.c.bf16 %v68_v24, %v67_v23  ;;  %v52_v29 = vld [vmem:[#allocation5 + $0x48] sm:$0xff]  ;;  %v69_v30 = vld [vmem:[#allocation5 + $0xd0] sm:$0xff]  ;;  %v70_v31 = vld [vmem:[#allocation5 + $0xd8] sm:$0xff]  ;;  %p302_p6 = pnand %p301_p5, %p295_p2 }
  0x2e   :  { %218 = vmatpush3.bf16.msra.mxu0 %v217_v13  ;;  %v229_v32 = vpack.c.bf16 %v52_v29, %v51_v28  ;;  %v231_v33 = vpack.c.bf16 %v70_v31, %v69_v30  ;;  %v53_v34 = vld [vmem:[#allocation5 + $0x50] sm:$0xff]  ;;  %v54_v35 = vld [vmem:[#allocation5 + $0x58] sm:$0xff]  ;;  %v71_v36 = vld [vmem:[#allocation5 + $0xe0] sm:$0xff] }
  0x2f   :  { %220 = vmatprep.subr.bf16.mxu0 %v219_v14  ;;  %v72_v37 = vld [vmem:[#allocation5 + $0xe8] sm:$0xff]  ;;  %v233_v38 = vpack.c.bf16 %v54_v35, %v53_v34  ;;  %v55_v40 = vld [vmem:[#allocation5 + $0x60] sm:$0xff]  ;;  %v73_v42 = vld [vmem:[#allocation5 + $0xf0] sm:$0xff] }
  0x30   :  { %v235_v39 = vpack.c.bf16 %v72_v37, %v71_v36  ;;  %v56_v41 = vld [vmem:[#allocation5 + $0x68] sm:$0xff]  ;;  %v74_v43 = vld [vmem:[#allocation5 + $0xf8] sm:$0xff]  ;;  %v57_v46 = vld [vmem:[#allocation5 + $0x70] sm:$0xff] }
  0x31   :  { %v237_v44 = vpack.c.bf16 %v56_v41, %v55_v40  ;;  %v239_v45 = vpack.c.bf16 %v74_v43, %v73_v42  ;;  %v58_v47 = vld [vmem:[#allocation5 + $0x78] sm:$0xff]  ;;  %v41_v49 = vld [vmem:[#allocation2] sm:$0xff] }
  0x32   :  { %222 = vmatpush3.bf16.msra.mxu0 %v221_v19  ;;  %v241_v48 = vpack.c.bf16 %v58_v47, %v57_v46  ;;  %v175_v52 = vld [vmem:[%s395_s2] ss:$0 sm:$0xff] }
  0x33   :  { %224 = vmatprep.subr.bf16.mxu0 %v223_v20 }
  0x36   :  { %226 = vmatpush3.bf16.msra.mxu0 %v225_v26 }
  0x37   :  { %228 = vmatprep.subr.bf16.mxu0 %v227_v27 }
  0x3a   :  { %230 = vmatpush3.bf16.msra.mxu0 %v229_v32 }
  0x3b   :  { %232 = vmatprep.subr.bf16.mxu0 %v231_v33 }
  0x3e   :  { %234 = vmatpush3.bf16.msra.mxu0 %v233_v38 }
  0x3f   :  { %236 = vmatprep.subr.bf16.mxu0 %v235_v39 }
  0x42   :  { %238 = vmatpush3.bf16.msra.mxu0 %v237_v44 }
  0x43   :  { %240 = vmatprep.subr.bf16.mxu0 %v239_v45 }
  0x46   :  { %242 = vmatpush3.bf16.msra.mxu0 %v241_v48 }
  0x49   :  { %147 = vmatmul.mubr.f32.vlgmr.msra.gmra.mrb[0].mxu0 %v41_v49 }
 0x11c   :  { %v208_v50 = vpop.f32.mrb[0].mxu0 }
 0x11d   :  { %v209_v51 = vpop.f32.mrb[1].mxu0 }
 0x11e   :  { %v210_v53 = vadd.f32 %v209_v51, %v208_v50 }
 0x120   :  { %v149_v54 = vadd.f32 %v210_v53, %v175_v52 }
 0x122   :  { %v152_v55 = vmul.f32 %v149_v54, %v149_v54 }
 0x124   :  { %153 = vadd.xlane.f32.xlu0 %v152_v55 }
 0x1b1   :  { %v154_v56 = vpop.xlane.xlu0 %153 }
 0x1b2   :  { %v155_v57 = vmax.f32 %v154_v56, 1e-24 }
 0x1b4   :  { %248 = vrsqrt.f32 %v155_v57 }
 0x1be   :  { %v249_v58 = vpop.eup %248 }
 0x1bf   :  { %v157_v59 = vmul.f32 %v249_v58, %v149_v54 }
 0x1c1   :  { %158 = vst [vmem:[#allocation7] sm:$0xff] %v157_v59 }
 0x1c2   :  { %305 = shalt.err (!%p302_p6)
}
 0x1c3   :  { %s306_s15 = scalar_lea.hbm %s396_s3, 128 }
 0x1c4   :  { %p307_p7 = scmp.ne.s32.totalorder %s396_s3, %s306_s15  ;;  %p310_p8 = scmp.lt.u32.totalorder %s306_s15, %s396_s3 }
 0x1c6   :  { %p312_p9 = pnand %p310_p8, %p307_p7 }
 0x1c8   :  { %315 = shalt.err (!%p312_p9)
}
 0x1c9   :  { %168 = dma.vmem_to_hbm [thread:$0]  %s166_s12, 128, %s396_s3, [#allocation4]  }
 0x1ca   :  { %320 = dma.done.wait [#allocation4], 128  }
 0x1cb   :  { %321 = vsyncadd [#allocation4], 4294967168 }
 0x1cc   :  { %172 = vsyncpa [#allocation3], 1 }
 0x1cd   :  { %173 = vsyncpa [#allocation6], 1 }
 0x1ce   :  { %174 = vsyncpa [#allocation4], 1 }

</bundles_post_ra>
